<compile_context>
chip_gen: v7x
topology: tpu7x:2x2x1
jax: 0.10.0
libtpu: 0.0.40
codegen_flags: <defaults>
</compile_context>

<pallas_src>
import functools
import math

import jax
import jax.numpy as jnp
from jax import lax
from jax.experimental import pallas as pl
from jax.experimental.pallas import tpu as pltpu


def _ls_kl_kernel(lp_ref, tgt_ref, loss_ref, acc_ref, *,
                  confidence, smoothing_value, ent_base, smooth_logsmooth,
                  ignore_index, ign_col, tile_v, vocab_size, needs_col_mask):
    """Grid = (batch_tile i, vocab_tile j). Accumulate sum_j p_j*log_q_j in VMEM scratch."""
    j = pl.program_id(1)

    @pl.when(j == 0)
    def _init():
        acc_ref[...] = jnp.zeros_like(acc_ref)

    lp = lp_ref[...].astype(jnp.float32)                      # (TB, TV) log-probs
    tb, tv = lp.shape
    lane = lax.broadcasted_iota(jnp.int32, (tb, tv), 1)       # column index within tile

    tgt = tgt_ref[...]                                        # (TB, 1) int32 targets
    tgt_rel = tgt - j * tile_v                                # target column, tile-relative
    ign_rel = ign_col - j * tile_v                            # ignore column, tile-relative

    if needs_col_mask:
        # Last vocab tile overruns V: padded lanes hold unspecified data -> zero them.
        lp = jnp.where(lane < (vocab_size - j * tile_v), lp, jnp.float32(0.0))

    is_tgt = lane == tgt_rel
    is_ign = lane == ign_rel
    # scatter_ happens after zeroing the ignore column, so target takes precedence.
    p = jnp.where(is_tgt, jnp.float32(confidence),
                  jnp.where(is_ign, jnp.float32(0.0), jnp.float32(smoothing_value)))

    # Cross term sum_j p_j * log_q_j, accumulated on the VPU (no per-tile reduce).
    acc_ref[...] += p * lp

    @pl.when(j == pl.num_programs(1) - 1)
    def _finalize():
        cross = jnp.sum(acc_ref[...], axis=1, keepdims=True)  # (TB, 1), one reduce per batch tile
        # Entropy term sum_j p_j*log(p_j), analytic (constants precomputed in Python):
        #   confidence*log(confidence) + n_smooth * smoothing*log(smoothing),
        #   n_smooth = V-2, or V-1 when target coincides with the ignore column.
        ent = jnp.where(tgt == ign_col,
                        jnp.float32(ent_base + smooth_logsmooth),
                        jnp.float32(ent_base))
        row_kl = ent - cross
        row_kl = jnp.where(tgt == ignore_index, jnp.float32(0.0), row_kl)
        loss_ref[...] = row_kl


def label_smoothing_loss(output, target, *, label_smoothing, tgt_vocab_size,
                         ignore_index=-100, tile_v=None, tile_b=None):
    """Pallas-backed LabelSmoothingLoss(label_smoothing, V, ignore_index)(output, target)."""
    B, V = output.shape
    assert V == tgt_vocab_size
    assert 0.0 < label_smoothing <= 1.0
    assert tgt_vocab_size > 2

    itemsize = jnp.dtype(output.dtype).itemsize
    row_pack = 8 * max(1, 4 // itemsize)          # sublane packing: 8 (f32), 16 (bf16), ...

    if tile_b is None:
        tile_b = B                                 # full-batch block is always layout-legal
        for cand in (4 * row_pack, 2 * row_pack, row_pack):
            if cand < B and B % cand == 0:
                tile_b = cand
                break
    assert B % tile_b == 0 and (tile_b == B or tile_b % row_pack == 0)

    if tile_v is None:
        tile_v = 2048
    tile_v = min(int(tile_v), V)
    if tile_v < V:
        tile_v = max(128, (tile_v // 128) * 128)   # lane dim must be a multiple of 128 when tiled
    nv = -(-V // tile_v)
    needs_col_mask = (V % tile_v) != 0

    smoothing_value = float(label_smoothing) / (tgt_vocab_size - 2)
    confidence = 1.0 - float(label_smoothing)
    smooth_logsmooth = smoothing_value * math.log(smoothing_value)
    conf_logconf = confidence * math.log(confidence) if confidence > 0.0 else 0.0
    ent_base = conf_logconf + (tgt_vocab_size - 2) * smooth_logsmooth
    # torch allows negative indexing into the one_hot buffer (one_hot[ignore_index] = 0)
    ign_col = int(ignore_index) % tgt_vocab_size

    target2d = target.astype(jnp.int32).reshape(B, 1)

    kernel = functools.partial(
        _ls_kl_kernel,
        confidence=confidence,
        smoothing_value=smoothing_value,
        ent_base=ent_base,
        smooth_logsmooth=smooth_logsmooth,
        ignore_index=int(ignore_index),
        ign_col=ign_col,
        tile_v=tile_v,
        vocab_size=V,
        needs_col_mask=needs_col_mask,
    )

    # generous scoped-VMEM budget: double-buffered input tile + f32 accumulator + slack
    need = 2 * tile_b * tile_v * itemsize + tile_b * tile_v * 4 + (4 << 20)
    vmem_limit = int(min(max(need, 32 << 20), 64 << 20))

    per_row = pl.pallas_call(
        kernel,
        out_shape=jax.ShapeDtypeStruct((B, 1), jnp.float32),
        grid_spec=pltpu.PrefetchScalarGridSpec(
            num_scalar_prefetch=0,
            grid=(B // tile_b, nv),
            in_specs=[
                pl.BlockSpec((tile_b, tile_v), lambda i, j: (i, j)),  # log-prob tile (native dtype)
                pl.BlockSpec((tile_b, 1), lambda i, j: (i, 0)),       # targets, resident per batch tile
            ],
            out_specs=pl.BlockSpec((tile_b, 1), lambda i, j: (i, 0)), # per-row KL, written on last vocab tile
            scratch_shapes=[pltpu.VMEM((tile_b, tile_v), jnp.float32)],
        ),
        compiler_params=pltpu.CompilerParams(
            dimension_semantics=("parallel", "arbitrary"),
            vmem_limit_bytes=vmem_limit,
        ),
    )(output, target2d)

    return jnp.sum(per_row)


def _reference_loss(output, target, *, label_smoothing, tgt_vocab_size, ignore_index):
    """Plain-JAX reference mirroring the PyTorch forward exactly."""
    B, V = output.shape
    smoothing_value = label_smoothing / (tgt_vocab_size - 2)
    confidence = 1.0 - label_smoothing
    one_hot = jnp.full((V,), smoothing_value, dtype=jnp.float32)
    one_hot = one_hot.at[ignore_index].set(0.0)
    model_prob = jnp.tile(one_hot[None, :], (B, 1))
    model_prob = model_prob.at[jnp.arange(B), target % V].set(confidence)
    model_prob = jnp.where((target == ignore_index)[:, None], 0.0, model_prob)
    lp = output.astype(jnp.float32)
    return jnp.sum(jnp.where(model_prob > 0,
                             model_prob * (jnp.log(model_prob) - lp),
                             0.0))


def _run_case(name, key, *, B, V, label_smoothing, ignore_index, dtype, tile_v,
              special_targets=()):
    k1, k2 = jax.random.split(key)
    logits = jax.random.normal(k1, (B, V), dtype=jnp.float32)
    logp = jax.nn.log_softmax(logits, axis=-1).astype(dtype)
    target = jax.random.randint(k2, (B,), 1, V, dtype=jnp.int32)
    for row, val in special_targets:
        target = target.at[row].set(val)

    loss = label_smoothing_loss(
        logp, target,
        label_smoothing=label_smoothing,
        tgt_vocab_size=V,
        ignore_index=ignore_index,
        tile_v=tile_v,
    )
    loss = jax.block_until_ready(loss)

    ref = _reference_loss(
        logp, target,
        label_smoothing=label_smoothing,
        tgt_vocab_size=V,
        ignore_index=ignore_index,
    )
    assert jnp.allclose(loss, ref, rtol=1e-4, atol=1e-4), (name, float(loss), float(ref))


if __name__ == "__main__":
    key = jax.random.PRNGKey(0)
    k1, k2, k3 = jax.random.split(key, 3)

    # Case 1: multi batch-tile + multi vocab-tile, f32, pad index 0, two ignored rows.
    _run_case("f32_multitile", k1, B=16, V=2048, label_smoothing=0.1,
              ignore_index=0, dtype=jnp.float32, tile_v=512,
              special_targets=[(0, 0), (3, 0)])

    # Case 2: V not divisible by tile_v (masked last tile), negative ignore_index,
    #         one target hitting the ignore column (V - 100).
    _run_case("f32_masked_tail", k2, B=8, V=640, label_smoothing=0.2,
              ignore_index=-100, dtype=jnp.float32, tile_v=512,
              special_targets=[(1, 540)])

    # Case 3: bf16 log-probs ingested natively (halved HBM traffic), multi vocab tiles.
    _run_case("bf16_native", k3, B=8, V=1024, label_smoothing=0.1,
              ignore_index=0, dtype=jnp.bfloat16, tile_v=256,
              special_targets=[(2, 0)])

    print("KERNEL_OK")
</pallas_src>

<mosaic_0001>
module attributes {stable_mosaic.version = 11 : i64} {
  func.func @_ls_kl_kernel(%arg0: i32, %arg1: i32, %arg2: memref<8x512xf32, #tpu.memory_space<vmem>>, %arg3: memref<8x1xi32, #tpu.memory_space<vmem>>, %arg4: memref<8x1xf32, #tpu.memory_space<vmem>>, %arg5: memref<8x512xf32, #tpu.memory_space<vmem>>) attributes {dimension_semantics = [#tpu.dimension_semantics<parallel>, #tpu.dimension_semantics<arbitrary>], iteration_bounds = array<i64: 2, 4>, scalar_prefetch = 0 : i64, scratch_operands = 1 : i64, tpu.core_type = #tpu.core_type<tc>, window_params = [{transform_indices = @transform_0, window_bounds = array<i64: 8, 512>}, {transform_indices = @transform_1, window_bounds = array<i64: 8, 1>}, {transform_indices = @transform_2, window_bounds = array<i64: 8, 1>}]} {
    %c0_i32 = arith.constant 0 : i32
    %0 = arith.cmpi eq, %arg1, %c0_i32 : i32
    %1 = arith.extui %0 : i1 to i32
    %c0_i32_0 = arith.constant 0 : i32
    %2 = arith.cmpi ne, %1, %c0_i32_0 : i32
    scf.if %2 {
      %cst_13 = arith.constant 0.000000e+00 : f32
      %27 = vector.broadcast %cst_13 : f32 to vector<8x512xf32>
      %c0_14 = arith.constant 0 : index
      %c0_15 = arith.constant 0 : index
      %28 = vector.load %arg5[%c0_14, %c0_15] : memref<8x512xf32, #tpu.memory_space<vmem>>, vector<8x512xf32>
      tpu.vector_store %arg5[%c0_14, %c0_15], %27 {strides = array<i32>} : memref<8x512xf32, #tpu.memory_space<vmem>>, vector<8x512xf32>,
    } else {
    }
    %c0 = arith.constant 0 : index
    %c0_1 = arith.constant 0 : index
    %3 = vector.load %arg2[%c0, %c0_1] : memref<8x512xf32, #tpu.memory_space<vmem>>, vector<8x512xf32>
    %4 = tpu.iota {dimensions = array<i32: 1>} : vector<8x512xi32>
    %c0_2 = arith.constant 0 : index
    %c0_3 = arith.constant 0 : index
    %5 = vector.load %arg3[%c0_2, %c0_3] : memref<8x1xi32, #tpu.memory_space<vmem>>, vector<8x1xi32>
    %c512_i32 = arith.constant 512 : i32
    %6 = arith.muli %arg1, %c512_i32 : i32
    %7 = vector.broadcast %6 : i32 to vector<8x1xi32>
    %8 = arith.subi %5, %7 : vector<8x1xi32>
    %c512_i32_4 = arith.constant 512 : i32
    %9 = arith.muli %arg1, %c512_i32_4 : i32
    %c0_i32_5 = arith.constant 0 : i32
    %10 = arith.subi %c0_i32_5, %9 : i32
    %11 = vector.broadcast %8 : vector<8x1xi32> to vector<8x512xi32>
    %12 = arith.cmpi eq, %4, %11 : vector<8x512xi32>
    %13 = vector.broadcast %10 : i32 to vector<8x512xi32>
    %14 = arith.cmpi eq, %4, %13 : vector<8x512xi32>
    %cst = arith.constant 0.000000e+00 : f32
    %cst_6 = arith.constant 4.8875856E-5 : f32
    %15 = vector.broadcast %cst : f32 to vector<8x512xf32>
    %16 = vector.broadcast %cst_6 : f32 to vector<8x512xf32>
    %17 = arith.select %14, %15, %16 : vector<8x512xi1>, vector<8x512xf32>
    %cst_7 = arith.constant 0.899999976 : f32
    %18 = vector.broadcast %cst_7 : f32 to vector<8x512xf32>
    %19 = arith.select %12, %18, %17 : vector<8x512xi1>, vector<8x512xf32>
    %c0_8 = arith.constant 0 : index
    %c0_9 = arith.constant 0 : index
    %20 = vector.load %arg5[%c0_8, %c0_9] : memref<8x512xf32, #tpu.memory_space<vmem>>, vector<8x512xf32>
    %21 = arith.mulf %19, %3 : vector<8x512xf32>
    %22 = arith.addf %20, %21 : vector<8x512xf32>
    %c0_10 = arith.constant 0 : index
    %c0_11 = arith.constant 0 : index
    %23 = vector.load %arg5[%c0_10, %c0_11] : memref<8x512xf32, #tpu.memory_space<vmem>>, vector<8x512xf32>
    tpu.vector_store %arg5[%c0_10, %c0_11], %22 {strides = array<i32>} : memref<8x512xf32, #tpu.memory_space<vmem>>, vector<8x512xf32>,
    %c3_i32 = arith.constant 3 : i32
    %24 = arith.cmpi eq, %arg1, %c3_i32 : i32
    %25 = arith.extui %24 : i1 to i32
    %c0_i32_12 = arith.constant 0 : i32
    %26 = arith.cmpi ne, %25, %c0_i32_12 : i32
    scf.if %26 {
      %c0_13 = arith.constant 0 : index
      %c0_14 = arith.constant 0 : index
      %27 = vector.load %arg5[%c0_13, %c0_14] : memref<8x512xf32, #tpu.memory_space<vmem>>, vector<8x512xf32>
      %cst_15 = arith.constant dense<0.000000e+00> : vector<8xf32>
      %28 = vector.multi_reduction <add>, %27, %cst_15 [1] : vector<8x512xf32> to vector<8xf32>
      %29 = vector.shape_cast %28 : vector<8xf32> to vector<8x1xf32>
      %c0_i32_16 = arith.constant 0 : i32
      %30 = vector.broadcast %c0_i32_16 : i32 to vector<8x1xi32>
      %31 = arith.cmpi eq, %5, %30 : vector<8x1xi32>
      %cst_17 = arith.constant -1.08793235 : f32
      %cst_18 = arith.constant -1.08744717 : f32
      %32 = vector.broadcast %cst_17 : f32 to vector<8x1xf32>
      %33 = vector.broadcast %cst_18 : f32 to vector<8x1xf32>
      %34 = arith.select %31, %32, %33 : vector<8x1xi1>, vector<8x1xf32>
      %35 = arith.subf %34, %29 : vector<8x1xf32>
      %c0_i32_19 = arith.constant 0 : i32
      %36 = vector.broadcast %c0_i32_19 : i32 to vector<8x1xi32>
      %37 = arith.cmpi eq, %5, %36 : vector<8x1xi32>
      %cst_20 = arith.constant 0.000000e+00 : f32
      %38 = vector.broadcast %cst_20 : f32 to vector<8x1xf32>
      %39 = arith.select %37, %38, %35 : vector<8x1xi1>, vector<8x1xf32>
      %c0_21 = arith.constant 0 : index
      %c0_22 = arith.constant 0 : index
      %40 = vector.load %arg4[%c0_21, %c0_22] : memref<8x1xf32, #tpu.memory_space<vmem>>, vector<8x1xf32>
      tpu.vector_store %arg4[%c0_21, %c0_22], %39 {strides = array<i32>} : memref<8x1xf32, #tpu.memory_space<vmem>>, vector<8x1xf32>,
    } else {
    }
    return
  }
  func.func @transform_0(%arg0: i32, %arg1: i32) -> (i32, i32) {
    %c0_i32 = arith.constant 0 : i32
    return %arg0, %arg1 : i32, i32
  }
  func.func @transform_1(%arg0: i32, %arg1: i32) -> (i32, i32) {
    %c0_i32 = arith.constant 0 : i32
    %c0_i32_0 = arith.constant 0 : i32
    return %arg0, %c0_i32 : i32, i32
  }
  func.func @transform_2(%arg0: i32, %arg1: i32) -> (i32, i32) {
    %c0_i32 = arith.constant 0 : i32
    %c0_i32_0 = arith.constant 0 : i32
    return %arg0, %c0_i32 : i32, i32
  }
}

</mosaic_0001>

<bundles_post_ra>
// kernel: tpu_custom_call.1
= control target key start
LH: loop header
LB: loop body
LE: loop exit
PB: predicated region body
PF: predicated region fallthrough
CT: control target
= control target key end

     0   :  { %7 = vsyncpa [#allocation4], 0  ;;  %s742_s0 = inlined_call_operand.hbm [shape: f32[16,2048], index: 0, kind: input, shape index: {}]   ;;  %s743_s1 = inlined_call_operand.vmem [shape: s32[16,1], index: 1, kind: input, shape index: {}]   ;;  %s744_s2 = inlined_call_operand.vmem [shape: f32[16,1], index: 2, kind: output, shape index: {}]  }
   0x1   :  { %9 = vsyncpa [#allocation4 + $0x1], 0  ;;  %s573_s9 = smov 0   ;;  %s575_s10 = smov 0  }
   0x2   :  { %s577_s11 = smov 0   ;;  %s579_s12 = smov 0  }
   0x3   :  { %s581_s13 = smov 0   ;;  %s583_s14 = smov 0  }
   0x4   :  { %s585_s15 = smov 0   ;;  %s587_s16 = smov 0  }
   0x5 LB: > { %s362_s17 = sadd.s32 4294967295, %s551_s16   ;;  %s24_s18 = sadd.s32 1, %s543_s14  ;;  %s551_s16 = sphi %s587_s16, %s15_s16   ;;  %s547_s15 = sphi %s585_s15, %s756_s15   ;;  %s543_s14 = sphi %s583_s14, %s755_s14   ;;  %s539_s13 = sphi %s581_s13, %s754_s13   ;;  %s535_s12 = sphi %s579_s12, %s753_s12   ;;  %s531_s11 = sphi %s577_s11, %s752_s11   ;;  %s527_s10 = sphi %s575_s10, %s751_s10   ;;  %s523_s9 = sphi %s573_s9, %s750_s9  }
   0x6   : > { %p25_p0 = scmp.ge.s32.totalorder %s24_s18, 4  ;;  %s27_s19 = sadd.s32 1, %s547_s15 }
   0x7   : > { %s36_s20 = sadd.s32 1, %s531_s11  ;;  %p43_p1 = scmp.ne.s32.totalorder %s531_s11, %s527_s10 }
   0x8   : > { %s758_s18 = smov (%p25_p0, %s24_s18), 0  ;;  %s760_s19 = smov (!%p25_p0, %s27_s19), %s547_s15 }
   0x9   : > { %s32_s21 = ssub.s32 %s543_s14, %s758_s18  ;;  %p44_p2 = scmp.eq.s32.totalorder %s551_s16, 0 }
   0xa   : > { %p29_p3 = scmp.ge.s32.totalorder %s760_s19, 2  ;;  %p49_p4 = scmp.ne.s32.totalorder %s527_s10, %s523_s9 }
   0xb   : > { %p624_p5 = por %p44_p2, %p43_p1  ;;  %p50_p6 = scmp.eq.s32.totalorder %s362_s17, 0 }
   0xc   : > { %s762_s19 = smov (%p29_p3, %s760_s19), 0  ;;  %p385_p8 = scmp.lt.s32.totalorder %s551_s16, 8 }
   0xd   : > { %p630_p7 = por %p50_p6, %p49_p4  ;;  %s31_s24 = ssub.s32 %s547_s15, %s762_s19 }
   0xe   : > { %s33_s25 = sor.u32 %s32_s21, %s31_s24  ;;  %s125_s26 = sand.u32 1, %s531_s11  }
   0xf   : > { %p34_p9 = scmp.eq.s32.totalorder %s33_s25, 0  ;;  %s366_s27 = sshll.u32 %s125_s26, 5 }
  0x10   : > { %s367_s28 = sshll.u32 %s543_s14, 2  ;;  %s368_s30 = sshll.u32 %s547_s15, 4 }
  0x11   : > { %s640_s29 = scalar_select %p34_p9, %s531_s11, %s36_s20  }
  0x12   : > { %s135_s3 = sadd.s32 %s368_s30, %s367_s28  ;;  %s129_s4 = scalar_lea.vmem [#allocation3], %s366_s27 }
  0x13   : > { %s139_s5 = sshll.u32 %s129_s4, 4  ;;  %s369_s6 = sshll.u32 %s135_s3, 7  ;;  %s643_s5 = int_to_ptr.vmem [resolvable:$true] %s139_s5 }
  0x14   : > { %s648_s9 = scalar_lea.hbm %s742_s0, %s369_s6  ;;  %p654_p10 = pnand %p385_p8, %p624_p5 }
  0x15   : > { %s126_s20 = scalar_lea.sflag [#allocation4], %s125_s26  ;;  %s455_s21 = scalar_lea.hbm %s648_s9, 512 }
  0x16   : > { %p456_p13 = scmp.ne.s32.totalorder %s648_s9, %s455_s21  ;;  %p457_p0 = pneg %p654_p10 }
  0x17   : > { %s460_s25 = scalar_lea.hbm %s742_s0, 4096  ;;  %p461_p3 = scmp.lt.u32.totalorder %s648_s9, %s742_s0 }
  0x18   : > { %p458_p1 = pnand %p457_p0, %p456_p13  ;;  %p462_p4 = scmp.lt.u32.totalorder %s460_s25, %s455_s21 }
  0x19   : > { %p464_p6 = scmp.lt.u32.totalorder %s455_s21, %s648_s9 }
  0x1a   : > { %p459_p2 = pneg %p458_p1  ;;  %p463_p5 = por %p462_p4, %p461_p3 }
  0x1c   : > { %p465_p8 = por %p464_p6, %p463_p5 }
  0x1e   : > { %p466_p9 = pnand %p465_p8, %p459_p2 }
  0x20   : > { %469 = shalt.err (!%p466_p9)
}
  0x21   : > { %s470_s26 = scalar_lea.vmem %s643_s5, 512  ;;  %s553_s30 = smov [#allocation3]  }
  0x22   : > { %p471_p13 = scmp.ne.s32.totalorder %s643_s5, %s470_s26  ;;  %s475_s3 = sshll.u32 %s553_s30, 4  ;;  %s476_s3 = int_to_ptr.vmem [resolvable:$false] %s475_s3 }
  0x23   : > { %s477_s4 = scalar_lea.vmem %s476_s3, 1024  ;;  %p478_p12 = scmp.lt.s32.totalorder %s643_s5, %s476_s3 }
  0x24   : > { %p473_p1 = pnand %p471_p13, %p457_p0  ;;  %p479_p3 = scmp.lt.s32.totalorder %s477_s4, %s470_s26 }
  0x26   : > { %p474_p11 = pneg %p473_p1  ;;  %p480_p4 = por %p479_p3, %p478_p12 }
  0x28   : > { %p481_p5 = pnand %p480_p4, %p474_p11 }
  0x2a   : > { %484 = shalt.err (!%p481_p5)
}
  0x2b   : > { %384 = dma.hbm_to_vmem [thread:$0]  (!%p654_p10), %s648_s9, 512, %s643_s5, %s126_s20  }
  0x2c   : > { %p748_p2 = scmp.lt.s32.totalorder %s551_s16, 9  ;;  %p749_p6 = scmp.ge.s32.totalorder %s551_s16, 1 }
  0x2e   : > { %p152_p0 = pnand %p749_p6, %p748_p2 }
  0x2f   : > { %s157_s6 = sand.u32 (!%p152_p0), 1, %s527_s10  }
  0x30   : > { %155 = sbr.rel (%p152_p0) target bundleno = 363 (0x16b), region = 28  ;;  %s371_s7 = sshll.u32 (!%p152_p0), %s157_s6, 5 }
  0x31   : > { %s158_s8 = scalar_lea.sflag (!%p152_p0), [#allocation4], %s157_s6  ;;  %s690_s21 = scalar_lea.vmem (!%p152_p0), [#allocation3], %s371_s7 }
  0x37   : > { %518 = dma.done.wait (%p630_p7), %s158_s8, 512  }
  0x38   : > { %520 = vsyncadd (%p630_p7), %s158_s8, 4294966784  ;;  %p186_p11 = scmp.lt.s32.totalorder %s539_s13, 1  ;;  %p374_p10 = scmp.ne.s32.totalorder %s535_s12, 0 }
  0x39   : > { %v554_v0 = vmov (!%p374_p10), 0.0  }
  0x3a   : > { %s764_s13 = smov (!%p186_p11, %s539_s13), 1  ;;  %197 = sbr.rel (%p374_p10) target bundleno = 65 (0x41), region = 36 }
  0x3b   : > { %s372_s5 = sshll.u32 %s764_s13, 3  ;;  %198 = vst [vmem:[#allocation2] sm:$0xff] (!%p374_p10), %v554_v0  ;;  %199 = vst [vmem:[#allocation2 + $0x8] sm:$0xff] (!%p374_p10), %v554_v0 }
  0x3c   : > { %s189_s20 = scalar_lea.vmem %s743_s1, %s372_s5  ;;  %s704_s25 = scalar_lea.vmem %s744_s2, %s372_s5  ;;  %200 = vst [vmem:[#allocation2 + $0x10] sm:$0xff] (!%p374_p10), %v554_v0  ;;  %201 = vst [vmem:[#allocation2 + $0x18] sm:$0xff] (!%p374_p10), %v554_v0 }
  0x41 PF: > { %v707_v1 = vld [vmem:[%s189_s20] sm:$0xff]  ;;  %s375_s13 = sshll.u32 %s535_s12, 9  ;;  %v555_v2 = vmov 0   ;;  %v206_v5 = vlaneseq  ;;  %v556_v11 = vmov 4.8875856e-05   ;;  %v203_v18 = vld [vmem:[%s690_s21 + $0x8] sm:$0xff] }
  0x42   : > { %454 = vset.pattern.permute.xlu0 %v555_v2  ;;  %v213_v3 = vstv %s375_s13  ;;  %s215_s23 = ssub.s32 0, %s375_s13  ;;  %v236_v15 = vld [vmem:[#allocation2] sm:$0xff]  ;;  %v204_v19 = vld [vmem:[%s690_s21 + $0x10] sm:$0xff]  ;;  %v237_v21 = vld [vmem:[#allocation2 + $0x8] sm:$0xff]  ;;  %p376_p7 = scmp.ne.s32.totalorder %s535_s12, 3 }
  0x43   : > { %v214_v4 = vsub.s32 %v707_v1, %v213_v3  ;;  %v207_v6 = vand.u32 127, %v206_v5  ;;  %v223_v9 = vstv %s215_s23  ;;  %v202_v17 = vld [vmem:[%s690_s21] sm:$0xff]  ;;  %v238_v22 = vld [vmem:[#allocation2 + $0x10] sm:$0xff]  ;;  %v205_v23 = vld [vmem:[%s690_s21 + $0x18] sm:$0xff]  ;;  %vm265_vm8 = vcmp.eq.s32.totalorder (!%p376_p7), %v707_v1, 0 }
  0x44   : > { %v239_v27 = vld [vmem:[#allocation2 + $0x18] sm:$0xff]  ;;  %v557_v44 = vmov (!%p376_p7), -1.0874472   ;;  %vm269_vm9 = vcmask (!%p376_p7), 7168  }
  0x45   : > { %217 = vperm.xlu0 %454, %v214_v4   ;;  %v208_v7 = vadd.s32 128, %v207_v6  ;;  %v209_v8 = vadd.s32 256, %v207_v6  ;;  %v210_v10 = vadd.s32 384, %v207_v6  ;;  %vm224_vm0 = vcmp.eq.s32.totalorder %v207_v6, %v223_v9 }
  0x46   : > { %v228_v12 = vsel %vm224_vm0, 0.0, %v556_v11  ;;  %v266_v45 = vsel (!%p376_p7), %vm265_vm8, -1.0879323, %v557_v44 }
  0x47   : > { %vm225_vm1 = vcmp.eq.s32.totalorder %v208_v7, %v223_v9  ;;  %vm226_vm2 = vcmp.eq.s32.totalorder %v209_v8, %v223_v9  ;;  %vm227_vm3 = vcmp.eq.s32.totalorder %v210_v10, %v223_v9 }
  0x48   : > { %v229_v13 = vsel %vm225_vm1, 0.0, %v556_v11  ;;  %v230_v14 = vsel %vm226_vm2, 0.0, %v556_v11  ;;  %v231_v20 = vsel %vm227_vm3, 0.0, %v556_v11 }
  0xc4   : > { %v218_v16 = vpop.permute.xlu0 %217 }
  0xc5   : > { %vm219_vm4 = vcmp.eq.s32.totalorder %v207_v6, %v218_v16  ;;  %vm220_vm5 = vcmp.eq.s32.totalorder %v208_v7, %v218_v16  ;;  %vm221_vm6 = vcmp.eq.s32.totalorder %v209_v8, %v218_v16  ;;  %vm222_vm7 = vcmp.eq.s32.totalorder %v210_v10, %v218_v16 }
  0xc6   : > { %v232_v24 = vsel %vm219_vm4, 0.9, %v228_v12  ;;  %v233_v25 = vsel %vm220_vm5, 0.9, %v229_v13  ;;  %v234_v26 = vsel %vm221_vm6, 0.9, %v230_v14 }
  0xc7   : > { %v235_v28 = vsel %vm222_vm7, 0.9, %v231_v20  ;;  %v240_v29 = vmul.f32 %v232_v24, %v202_v17  ;;  %v241_v30 = vmul.f32 %v233_v25, %v203_v18  ;;  %v242_v31 = vmul.f32 %v234_v26, %v204_v19  ;;  %255 = sbr.rel (%p376_p7) target bundleno = 363 (0x16b), region = 40 }
  0xc8   : > { %v243_v32 = vmul.f32 %v235_v28, %v205_v23 }
  0xc9   : > { %v244_v33 = vadd.f32 %v240_v29, %v236_v15  ;;  %v245_v34 = vadd.f32 %v241_v30, %v237_v21  ;;  %v246_v35 = vadd.f32 %v242_v31, %v238_v22 }
  0xca   : > { %v247_v36 = vadd.f32 %v243_v32, %v239_v27 }
  0xcb   : > { %248 = vst [vmem:[#allocation2] sm:$0xff] %v244_v33  ;;  %249 = vst [vmem:[#allocation2 + $0x8] sm:$0xff] %v245_v34 }
  0xcc   : > { %250 = vst [vmem:[#allocation2 + $0x10] sm:$0xff] %v246_v35  ;;  %251 = vst [vmem:[#allocation2 + $0x18] sm:$0xff] %v247_v36 }
  0xd2   : > { %v256_v37 = vld [vmem:[#allocation2] sm:$0xff]  ;;  %v257_v38 = vld [vmem:[#allocation2 + $0x8] sm:$0xff] }
  0xd3   : > { %v258_v39 = vld [vmem:[#allocation2 + $0x10] sm:$0xff]  ;;  %v260_v40 = vadd.f32 %v257_v38, %v256_v37  ;;  %v259_v41 = vld [vmem:[#allocation2 + $0x18] sm:$0xff] }
  0xd5   : > { %v261_v42 = vadd.f32 %v260_v40, %v258_v39 }
  0xd7   : > { %v262_v43 = vadd.f32 %v261_v42, %v259_v41 }
  0xd9   : > { %263 = vadd.xlane.f32.xlu0 %v262_v43 }
 0x166   : > { %v264_v46 = vpop.xlane.xlu0 %263 }
 0x167   : > { %v267_v47 = vsub.f32 %v266_v45, %v264_v46 }
 0x169   : > { %v268_v48 = vsel %vm265_vm8, 0.0, %v267_v47 }
 0x16a   : > { %270 = vst.msk [vmem:[%s704_s25] sm:$0xff] %vm269_vm9, %v268_v48 }
 0x16b PF: > { %s15_s16 = sadd.s32 1, %s551_s16   ;;  %s750_s9 = smov %s527_s10 }
 0x16c   : > { %p12_p12 = scmp.ge.s32.totalorder %s15_s16, 10   ;;  %s751_s10 = smov %s531_s11 }
 0x16d   : > { %s752_s11 = smov %s640_s29  ;;  %s753_s12 = smov %s543_s14 }
 0x16e   : > { %s754_s13 = smov %s547_s15  ;;  %s755_s14 = smov %s758_s18 }
 0x16f   : > { %s756_s15 = smov %s762_s19  ;;  %14 = sbr.rel (!%p12_p12) target bundleno = 5 (0x5), region = 79 }
 0x176   :  { %290 = vsyncpa [#allocation4], 1 }
 0x177   :  { %292 = vsyncpa [#allocation4 + $0x1], 1 }

</bundles_post_ra>
